<compile_context>
chip_gen: v5e
topology: v5e:2x2
jax: 0.10.0
libtpu: 0.0.40
codegen_flags: <defaults>
</compile_context>

<pallas_src>
import numpy as np
import jax
import jax.numpy as jnp
from jax.experimental import pallas as pl
from jax.experimental.pallas import tpu as pltpu

DATA_DIM   = 16
ENC_LAYERS = (32, 32, 32)
HID        = ENC_LAYERS[0]          # all hidden layers are 32 wide
LATENT_DIM = 8
N_CLUSTER  = 5                      # c_prior / z_log_*_prior exist but are unused in forward
BATCH      = 8
N_EPS_CAND = 4                      # normal candidates emulating "resample until v > 0"
N_LAYERS   = 8                      # fc1, fc2, fc3, fc41|fc42, fc4, fc5, fc6, fc7


def _relu(x):
    return jnp.maximum(x, 0.0)


def _softplus(x):
    # torch.nn.Softplus(beta=1): log(1 + exp(x)), numerically stable
    return jnp.logaddexp(x, 0.0)


# --------------------------------------------------------------------------- #
# Kernel: encoder MLP -> gamma reparametrization -> decoder MLP (+softplus)    #
# --------------------------------------------------------------------------- #
def vae_gamma_kernel(x_ref, rand_ref, w_ref, b_ref, dec_ref, lat_ref):
    f32 = jnp.float32
    dot = lambda a, b: jnp.dot(a, b, preferred_element_type=f32)

    Bb = b_ref[...]                              # [8, 32] bias slab (one vreg-ish)
    bias = lambda i: Bb[i:i + 1, :]              # static slice -> [1, 32]

    # ---------------- encoder: fc1 -> fc2 -> fc3 -> fused(fc41|fc42) --------
    x = x_ref[...]                                            # [B, 16]
    h = _relu(dot(x, w_ref[0][:DATA_DIM, :]) + bias(0))       # fc1
    h = _relu(dot(h, w_ref[1]) + bias(1))                     # fc2
    h = _relu(dot(h, w_ref[2]) + bias(2))                     # fc3
    # fused fc41|fc42: real output is the first 2*LATENT_DIM lanes (rest padded w/ 0)
    ab = 1e-6 + _softplus(dot(h, w_ref[3]) + bias(3))         # [B, 32]
    alpha = ab[:, :LATENT_DIM]                                # [B, 8]
    beta  = ab[:, LATENT_DIM:2 * LATENT_DIM]                  # [B, 8]

    # ------------- gamma reparametrization (generate_gamma code path) -------
    rand = rand_ref[...]                                      # [6, B, 8]
    any_lt1 = jnp.min(alpha) < 1.0                            # scalar: torch's any(alpha<1)
    d = jnp.where(any_lt1, alpha + 1.0, alpha) - (1.0 / 3.0)
    c = 1.0 / jnp.sqrt(9.0 * d)

    # "resample eps until 1 + c*eps > 0": first valid of N_EPS_CAND candidates
    # TODO(synk): if all candidates fail (prob ~0), v is clamped instead of resampled.
    eps = rand[N_EPS_CAND - 1]
    for k in range(N_EPS_CAND - 2, -1, -1):
        cand = rand[k]
        eps = jnp.where(1.0 + c * cand > 0.0, cand, eps)
    v = jnp.maximum(1.0 + c * eps, 1e-12)   # reference returns the un-cubed v (itera//500==0 path)

    u  = rand[N_EPS_CAND]
    u2 = rand[N_EPS_CAND + 1]
    e2 = eps * eps
    index1 = u >= 1.0 - 0.0331 * e2 * e2
    index2 = jnp.log(u) >= 0.5 * e2 + d * (1.0 - v + jnp.log(v))
    u = jnp.where(index1 & index2, u2, u)   # torch resamples u where both hold

    z_lt1 = jnp.exp(jnp.log(d * v + 1e-6) + jnp.log(u + 1e-6) / (alpha + 1e-6)) / (beta + 1e-6)
    z_ge1 = d * v / (beta + 1e-6)
    # TODO(synk): the all-alpha>=1 branch of generate_gamma has an outer host-side
    # rejection loop ("continue" until not(index1 & index2)); truncated to one iteration.
    z = jnp.where(any_lt1, z_lt1, z_ge1)                      # [B, 8]

    # ---------------- decoder: fc4 -> fc5 -> fc6 -> fc7 ----------------------
    h = _relu(dot(z, w_ref[4][:LATENT_DIM, :]) + bias(4))     # fc4
    h = _relu(dot(h, w_ref[5]) + bias(5))                     # fc5
    h = _relu(dot(h, w_ref[6]) + bias(6))                     # fc6
    out = dot(h, w_ref[7]) + bias(7)                          # fc7 -> [B, 32]

    # one lane-dense decoder-head store; recon_al / recon_be split in the wrapper
    dec_ref[...] = 1e-6 + _softplus(out)
    # packed latent outputs: [alpha; beta; z] along a leading axis (no lane concat)
    lat_ref[0, :, :] = alpha
    lat_ref[1, :, :] = beta
    lat_ref[2, :, :] = z


# --------------------------------------------------------------------------- #
# Host-side packing + wrapper                                                  #
# --------------------------------------------------------------------------- #
def pack_params(params):
    """Pack 18 Linear params into one [8,32,32] weight slab and one [8,32] bias slab.

    fc41 / fc42 are fused (concatenated along the output dim). All weights are
    zero-padded to [32, 32]; zero-padding is exact because the padded rows/cols
    are either multiplied by zeros or sliced away in the kernel.
    """
    (W1, b1, W2, b2, W3, b3, W41, b41, W42, b42,
     W4, b4, W5, b5, W6, b6, W7, b7) = params

    def pad_w(W):
        r, c = W.shape
        return jnp.pad(W, ((0, HID - r), (0, HID - c)))

    def pad_b(b):
        b = b.reshape(1, -1)
        return jnp.pad(b, ((0, 0), (0, HID - b.shape[-1])))

    W4142 = jnp.concatenate([W41, W42], axis=1)   # [32, 16]
    b4142 = jnp.concatenate([b41, b42], axis=1)   # [1, 16]

    w_list = [W1, W2, W3, W4142, W4, W5, W6, W7]
    b_list = [b1, b2, b3, b4142, b4, b5, b6, b7]
    w_slab = jnp.stack([pad_w(w) for w in w_list], axis=0)        # [8, 32, 32]
    b_slab = jnp.concatenate([pad_b(b) for b in b_list], axis=0)  # [8, 32]
    return w_slab, b_slab


def pack_rand(eps_cands, u, u2):
    # [N_EPS_CAND + 2, B, LATENT_DIM]
    return jnp.concatenate([eps_cands, u[None], u2[None]], axis=0)


def _cost_estimate(B):
    layer_kn = [(DATA_DIM, HID), (HID, HID), (HID, HID), (HID, HID),  # enc (fc41|42 padded)
                (LATENT_DIM, HID), (HID, HID), (HID, HID), (HID, 2 * DATA_DIM)]
    flops = 2 * B * sum(k * n for k, n in layer_kn)
    transcendentals = B * (2 * 2 * LATENT_DIM + 2 * 2 * DATA_DIM + 8 * LATENT_DIM)
    bytes_accessed = 4 * (N_LAYERS * HID * HID + N_LAYERS * HID          # params
                          + B * DATA_DIM + (N_EPS_CAND + 2) * B * LATENT_DIM   # inputs
                          + B * 2 * DATA_DIM + 3 * B * LATENT_DIM)       # outputs
    return pl.CostEstimate(flops=flops, transcendentals=transcendentals,
                           bytes_accessed=bytes_accessed)


def vae_gamma_forward(x, eps_cands, u, u2, w_slab, b_slab):
    B = x.shape[0]
    rand = pack_rand(eps_cands, u, u2)
    vmem = pl.BlockSpec(memory_space=pltpu.MemorySpace.VMEM)  # whole arrays resident in VMEM

    dec, lat = pl.pallas_call(
        vae_gamma_kernel,
        out_shape=(
            jax.ShapeDtypeStruct((B, 2 * DATA_DIM), jnp.float32),        # softplus(decode(z))
            jax.ShapeDtypeStruct((3, B, LATENT_DIM), jnp.float32),       # alpha | beta | z
        ),
        in_specs=[vmem] * 4,
        out_specs=(vmem, vmem),
        cost_estimate=_cost_estimate(B),
    )(x, rand, w_slab, b_slab)

    # free XLA slices in the wrapper (no masked sub-lane stores in the kernel)
    recon_al = dec[:, :DATA_DIM]
    recon_be = dec[:, DATA_DIM:]
    return recon_al, recon_be, lat[0], lat[1], lat[2]


# --------------------------------------------------------------------------- #
# Parameter init (matches torch.nn.Linear default init layout-wise)            #
# --------------------------------------------------------------------------- #
def init_params(key):
    def linear(k, fan_in, fan_out):
        kw, kb = jax.random.split(k)
        lim = 1.0 / np.sqrt(fan_in)
        W = jax.random.uniform(kw, (fan_in, fan_out), jnp.float32, -lim, lim)
        b = jax.random.uniform(kb, (1, fan_out), jnp.float32, -lim, lim)
        return W, b

    keys = jax.random.split(key, 9)
    W1,  b1  = linear(keys[0], DATA_DIM,       ENC_LAYERS[0])
    W2,  b2  = linear(keys[1], ENC_LAYERS[0],  ENC_LAYERS[1])
    W3,  b3  = linear(keys[2], ENC_LAYERS[1],  ENC_LAYERS[2])
    W41, b41 = linear(keys[3], ENC_LAYERS[2],  LATENT_DIM)
    W42, b42 = linear(keys[4], ENC_LAYERS[2],  LATENT_DIM)
    W4,  b4  = linear(keys[5], LATENT_DIM,     ENC_LAYERS[2])
    W5,  b5  = linear(keys[6], ENC_LAYERS[2],  ENC_LAYERS[1])
    W6,  b6  = linear(keys[7], ENC_LAYERS[1],  ENC_LAYERS[0])
    W7,  b7  = linear(keys[8], ENC_LAYERS[0],  DATA_DIM * 2)
    return [W1, b1, W2, b2, W3, b3, W41, b41, W42, b42,
            W4, b4, W5, b5, W6, b6, W7, b7]


# --------------------------------------------------------------------------- #
# Pure-JAX reference (same math, unpacked params) for correctness check        #
# --------------------------------------------------------------------------- #
def reference_forward(x, eps_cands, u, u2, params):
    (W1, b1, W2, b2, W3, b3, W41, b41, W42, b42,
     W4, b4, W5, b5, W6, b6, W7, b7) = params
    relu, sp = _relu, _softplus
    h1 = relu(x @ W1 + b1); h2 = relu(h1 @ W2 + b2); h3 = relu(h2 @ W3 + b3)
    alpha = 1e-6 + sp(h3 @ W41 + b41)
    beta  = 1e-6 + sp(h3 @ W42 + b42)
    any_lt1 = jnp.min(alpha) < 1.0
    d = jnp.where(any_lt1, alpha + 1.0, alpha) - 1.0 / 3.0
    c = 1.0 / jnp.sqrt(9.0 * d)
    eps = eps_cands[-1]
    for k in range(N_EPS_CAND - 2, -1, -1):
        cand = eps_cands[k]
        eps = jnp.where(1.0 + c * cand > 0.0, cand, eps)
    v = jnp.maximum(1.0 + c * eps, 1e-12)
    e2 = eps * eps
    i1 = u >= 1.0 - 0.0331 * e2 * e2
    i2 = jnp.log(u) >= 0.5 * e2 + d * (1.0 - v + jnp.log(v))
    uu = jnp.where(i1 & i2, u2, u)
    z_lt1 = jnp.exp(jnp.log(d * v + 1e-6) + jnp.log(uu + 1e-6) / (alpha + 1e-6)) / (beta + 1e-6)
    z_ge1 = d * v / (beta + 1e-6)
    z = jnp.where(any_lt1, z_lt1, z_ge1)
    h4 = relu(z @ W4 + b4); h5 = relu(h4 @ W5 + b5); h6 = relu(h5 @ W6 + b6)
    out = h6 @ W7 + b7
    return (1e-6 + sp(out[:, :DATA_DIM]), 1e-6 + sp(out[:, DATA_DIM:]), alpha, beta, z)


if __name__ == "__main__":
    key = jax.random.PRNGKey(0)
    kp, kx, keps, ku, ku2 = jax.random.split(key, 5)

    params = init_params(kp)
    w_slab, b_slab = pack_params(params)        # pack once; reuse across calls
    w_slab = jax.block_until_ready(w_slab)

    x = jax.random.uniform(kx, (BATCH, DATA_DIM), jnp.float32, 0.0, 1.0)
    eps_cands = jax.random.normal(keps, (N_EPS_CAND, BATCH, LATENT_DIM), jnp.float32)
    u  = jax.random.uniform(ku,  (BATCH, LATENT_DIM), jnp.float32, 1e-4, 1.0)
    u2 = jax.random.uniform(ku2, (BATCH, LATENT_DIM), jnp.float32, 1e-4, 1.0)

    outs = vae_gamma_forward(x, eps_cands, u, u2, w_slab, b_slab)
    outs = jax.block_until_ready(outs)

    ref = reference_forward(x, eps_cands, u, u2, params)
    for o, r in zip(outs, ref):
        np.testing.assert_allclose(np.asarray(o), np.asarray(r), rtol=1e-3, atol=1e-3)
        assert bool(jnp.all(jnp.isfinite(o)))

    print("KERNEL_OK")
</pallas_src>

<mosaic_0001>
module attributes {stable_mosaic.version = 11 : i64} {
  func.func @vae_gamma_kernel(%arg0: memref<8x16xf32, #tpu.memory_space<vmem>>, %arg1: memref<6x8x8xf32, #tpu.memory_space<vmem>>, %arg2: memref<8x32x32xf32, #tpu.memory_space<vmem>>, %arg3: memref<8x32xf32, #tpu.memory_space<vmem>>, %arg4: memref<8x32xf32, #tpu.memory_space<vmem>>, %arg5: memref<3x8x8xf32, #tpu.memory_space<vmem>>) attributes {dimension_semantics = [], scalar_prefetch = 0 : i64, scratch_operands = 0 : i64, tpu.core_type = #tpu.core_type<tc>} {
    %c0 = arith.constant 0 : index
    %c0_0 = arith.constant 0 : index
    %0 = vector.load %arg3[%c0, %c0_0] : memref<8x32xf32, #tpu.memory_space<vmem>>, vector<8x32xf32>
    %c0_1 = arith.constant 0 : index
    %c0_2 = arith.constant 0 : index
    %1 = vector.load %arg0[%c0_1, %c0_2] : memref<8x16xf32, #tpu.memory_space<vmem>>, vector<8x16xf32>
    %c0_3 = arith.constant 0 : index
    %c0_4 = arith.constant 0 : index
    %c0_5 = arith.constant 0 : index
    %2 = vector.load %arg2[%c0_3, %c0_4, %c0_5] : memref<8x32x32xf32, #tpu.memory_space<vmem>>, vector<1x32x32xf32>
    %3 = vector.shape_cast %2 : vector<1x32x32xf32> to vector<32x32xf32>
    %4 = vector.extract_strided_slice %3 {offsets = [0, 0], sizes = [16, 32], strides = [1, 1]} : vector<32x32xf32> to vector<16x32xf32>
    %cst = arith.constant dense<0.000000e+00> : vector<8x32xf32>
    %5 = tpu.matmul %1, %4, %cst {dimension_numbers = #tpu.dot_dimension_numbers<[1], [0], [0], [1], [0, 0, 1, 1], [], []>} : vector<8x16xf32>, vector<16x32xf32>, vector<8x32xf32> -> vector<8x32xf32>
    %6 = vector.extract_strided_slice %0 {offsets = [0, 0], sizes = [1, 32], strides = [1, 1]} : vector<8x32xf32> to vector<1x32xf32>
    %7 = vector.broadcast %6 : vector<1x32xf32> to vector<8x32xf32>
    %8 = arith.addf %5, %7 : vector<8x32xf32>
    %cst_6 = arith.constant 0.000000e+00 : f32
    %9 = vector.broadcast %cst_6 : f32 to vector<8x32xf32>
    %10 = arith.maximumf %8, %9 : vector<8x32xf32>
    %c1 = arith.constant 1 : index
    %c0_7 = arith.constant 0 : index
    %c0_8 = arith.constant 0 : index
    %11 = vector.load %arg2[%c1, %c0_7, %c0_8] : memref<8x32x32xf32, #tpu.memory_space<vmem>>, vector<1x32x32xf32>
    %12 = vector.shape_cast %11 : vector<1x32x32xf32> to vector<32x32xf32>
    %cst_9 = arith.constant dense<0.000000e+00> : vector<8x32xf32>
    %13 = tpu.matmul %10, %12, %cst_9 {dimension_numbers = #tpu.dot_dimension_numbers<[1], [0], [0], [1], [0, 0, 1, 1], [], []>} : vector<8x32xf32>, vector<32x32xf32>, vector<8x32xf32> -> vector<8x32xf32>
    %14 = vector.extract_strided_slice %0 {offsets = [1, 0], sizes = [1, 32], strides = [1, 1]} : vector<8x32xf32> to vector<1x32xf32>
    %15 = vector.broadcast %14 : vector<1x32xf32> to vector<8x32xf32>
    %16 = arith.addf %13, %15 : vector<8x32xf32>
    %cst_10 = arith.constant 0.000000e+00 : f32
    %17 = vector.broadcast %cst_10 : f32 to vector<8x32xf32>
    %18 = arith.maximumf %16, %17 : vector<8x32xf32>
    %c2 = arith.constant 2 : index
    %c0_11 = arith.constant 0 : index
    %c0_12 = arith.constant 0 : index
    %19 = vector.load %arg2[%c2, %c0_11, %c0_12] : memref<8x32x32xf32, #tpu.memory_space<vmem>>, vector<1x32x32xf32>
    %20 = vector.shape_cast %19 : vector<1x32x32xf32> to vector<32x32xf32>
    %cst_13 = arith.constant dense<0.000000e+00> : vector<8x32xf32>
    %21 = tpu.matmul %18, %20, %cst_13 {dimension_numbers = #tpu.dot_dimension_numbers<[1], [0], [0], [1], [0, 0, 1, 1], [], []>} : vector<8x32xf32>, vector<32x32xf32>, vector<8x32xf32> -> vector<8x32xf32>
    %22 = vector.extract_strided_slice %0 {offsets = [2, 0], sizes = [1, 32], strides = [1, 1]} : vector<8x32xf32> to vector<1x32xf32>
    %23 = vector.broadcast %22 : vector<1x32xf32> to vector<8x32xf32>
    %24 = arith.addf %21, %23 : vector<8x32xf32>
    %cst_14 = arith.constant 0.000000e+00 : f32
    %25 = vector.broadcast %cst_14 : f32 to vector<8x32xf32>
    %26 = arith.maximumf %24, %25 : vector<8x32xf32>
    %c3 = arith.constant 3 : index
    %c0_15 = arith.constant 0 : index
    %c0_16 = arith.constant 0 : index
    %27 = vector.load %arg2[%c3, %c0_15, %c0_16] : memref<8x32x32xf32, #tpu.memory_space<vmem>>, vector<1x32x32xf32>
    %28 = vector.shape_cast %27 : vector<1x32x32xf32> to vector<32x32xf32>
    %cst_17 = arith.constant dense<0.000000e+00> : vector<8x32xf32>
    %29 = tpu.matmul %26, %28, %cst_17 {dimension_numbers = #tpu.dot_dimension_numbers<[1], [0], [0], [1], [0, 0, 1, 1], [], []>} : vector<8x32xf32>, vector<32x32xf32>, vector<8x32xf32> -> vector<8x32xf32>
    %30 = vector.extract_strided_slice %0 {offsets = [3, 0], sizes = [1, 32], strides = [1, 1]} : vector<8x32xf32> to vector<1x32xf32>
    %31 = vector.broadcast %30 : vector<1x32xf32> to vector<8x32xf32>
    %32 = arith.addf %29, %31 : vector<8x32xf32>
    %cst_18 = arith.constant 0.000000e+00 : f32
    %33 = vector.broadcast %cst_18 : f32 to vector<8x32xf32>
    %34 = arith.maximumf %32, %33 : vector<8x32xf32>
    %35 = vector.broadcast %cst_18 : f32 to vector<8x32xf32>
    %36 = arith.subf %32, %35 : vector<8x32xf32>
    %37 = arith.cmpf one, %36, %36 : vector<8x32xf32>
    %38 = vector.broadcast %cst_18 : f32 to vector<8x32xf32>
    %39 = arith.addf %32, %38 : vector<8x32xf32>
    %40 = math.absf %36 : vector<8x32xf32>
    %cst_19 = arith.constant 0.000000e+00 : f32
    %41 = vector.broadcast %cst_19 : f32 to vector<8x32xf32>
    %42 = arith.subf %41, %40 : vector<8x32xf32>
    %43 = math.exp %42 : vector<8x32xf32>
    %44 = math.log1p %43 : vector<8x32xf32>
    %45 = arith.addf %34, %44 : vector<8x32xf32>
    %46 = arith.select %37, %39, %45 : vector<8x32xi1>, vector<8x32xf32>
    %cst_20 = arith.constant 9.99999997E-7 : f32
    %47 = vector.broadcast %cst_20 : f32 to vector<8x32xf32>
    %48 = arith.addf %47, %46 : vector<8x32xf32>
    %49 = vector.extract_strided_slice %48 {offsets = [0, 0], sizes = [8, 8], strides = [1, 1]} : vector<8x32xf32> to vector<8x8xf32>
    %50 = vector.extract_strided_slice %48 {offsets = [0, 8], sizes = [8, 8], strides = [1, 1]} : vector<8x32xf32> to vector<8x8xf32>
    %c0_21 = arith.constant 0 : index
    %c0_22 = arith.constant 0 : index
    %c0_23 = arith.constant 0 : index
    %51 = vector.load %arg1[%c0_21, %c0_22, %c0_23] : memref<6x8x8xf32, #tpu.memory_space<vmem>>, vector<6x8x8xf32>
    %52 = vector.shape_cast %49 : vector<8x8xf32> to vector<1x8x8xf32>
    %cst_24 = arith.constant dense<0x7F800000> : vector<1xf32>
    %53 = vector.multi_reduction <minimumf>, %52, %cst_24 [1, 2] : vector<1x8x8xf32> to vector<1xf32>
    %54 = vector.shape_cast %53 : vector<1xf32> to vector<1x1x1xf32>
    %55 = vector.extract %54[0, 0, 0] : f32 from vector<1x1x1xf32>
    %cst_25 = arith.constant 1.000000e+00 : f32
    %56 = arith.cmpf olt, %55, %cst_25 : f32
    %cst_26 = arith.constant 1.000000e+00 : f32
    %57 = vector.broadcast %cst_26 : f32 to vector<8x8xf32>
    %58 = arith.addf %49, %57 : vector<8x8xf32>
    %59 = arith.select %56, %58, %49 : vector<8x8xf32>
    %cst_27 = arith.constant 0.333333343 : f32
    %60 = vector.broadcast %cst_27 : f32 to vector<8x8xf32>
    %61 = arith.subf %59, %60 : vector<8x8xf32>
    %cst_28 = arith.constant 9.000000e+00 : f32
    %62 = vector.broadcast %cst_28 : f32 to vector<8x8xf32>
    %63 = arith.mulf %62, %61 : vector<8x8xf32>
    %64 = math.sqrt %63 : vector<8x8xf32>
    %cst_29 = arith.constant 1.000000e+00 : f32
    %65 = vector.broadcast %cst_29 : f32 to vector<8x8xf32>
    %66 = arith.divf %65, %64 : vector<8x8xf32>
    %67 = vector.extract_strided_slice %51 {offsets = [3, 0, 0], sizes = [1, 8, 8], strides = [1, 1, 1]} : vector<6x8x8xf32> to vector<1x8x8xf32>
    %68 = vector.shape_cast %67 : vector<1x8x8xf32> to vector<8x8xf32>
    %69 = vector.extract_strided_slice %51 {offsets = [2, 0, 0], sizes = [1, 8, 8], strides = [1, 1, 1]} : vector<6x8x8xf32> to vector<1x8x8xf32>
    %70 = vector.shape_cast %69 : vector<1x8x8xf32> to vector<8x8xf32>
    %71 = arith.mulf %66, %70 : vector<8x8xf32>
    %cst_30 = arith.constant 1.000000e+00 : f32
    %72 = vector.broadcast %cst_30 : f32 to vector<8x8xf32>
    %73 = arith.addf %72, %71 : vector<8x8xf32>
    %cst_31 = arith.constant 0.000000e+00 : f32
    %74 = vector.broadcast %cst_31 : f32 to vector<8x8xf32>
    %75 = arith.cmpf ogt, %73, %74 : vector<8x8xf32>
    %76 = arith.select %75, %70, %68 : vector<8x8xi1>, vector<8x8xf32>
    %77 = vector.extract_strided_slice %51 {offsets = [1, 0, 0], sizes = [1, 8, 8], strides = [1, 1, 1]} : vector<6x8x8xf32> to vector<1x8x8xf32>
    %78 = vector.shape_cast %77 : vector<1x8x8xf32> to vector<8x8xf32>
    %79 = arith.mulf %66, %78 : vector<8x8xf32>
    %cst_32 = arith.constant 1.000000e+00 : f32
    %80 = vector.broadcast %cst_32 : f32 to vector<8x8xf32>
    %81 = arith.addf %80, %79 : vector<8x8xf32>
    %cst_33 = arith.constant 0.000000e+00 : f32
    %82 = vector.broadcast %cst_33 : f32 to vector<8x8xf32>
    %83 = arith.cmpf ogt, %81, %82 : vector<8x8xf32>
    %84 = arith.select %83, %78, %76 : vector<8x8xi1>, vector<8x8xf32>
    %85 = vector.extract_strided_slice %51 {offsets = [0, 0, 0], sizes = [1, 8, 8], strides = [1, 1, 1]} : vector<6x8x8xf32> to vector<1x8x8xf32>
    %86 = vector.shape_cast %85 : vector<1x8x8xf32> to vector<8x8xf32>
    %87 = arith.mulf %66, %86 : vector<8x8xf32>
    %cst_34 = arith.constant 1.000000e+00 : f32
    %88 = vector.broadcast %cst_34 : f32 to vector<8x8xf32>
    %89 = arith.addf %88, %87 : vector<8x8xf32>
    %cst_35 = arith.constant 0.000000e+00 : f32
    %90 = vector.broadcast %cst_35 : f32 to vector<8x8xf32>
    %91 = arith.cmpf ogt, %89, %90 : vector<8x8xf32>
    %92 = arith.select %91, %86, %84 : vector<8x8xi1>, vector<8x8xf32>
    %93 = arith.mulf %66, %92 : vector<8x8xf32>
    %cst_36 = arith.constant 1.000000e+00 : f32
    %94 = vector.broadcast %cst_36 : f32 to vector<8x8xf32>
    %95 = arith.addf %94, %93 : vector<8x8xf32>
    %cst_37 = arith.constant 9.99999996E-13 : f32
    %96 = vector.broadcast %cst_37 : f32 to vector<8x8xf32>
    %97 = arith.maximumf %95, %96 : vector<8x8xf32>
    %98 = vector.extract_strided_slice %51 {offsets = [4, 0, 0], sizes = [1, 8, 8], strides = [1, 1, 1]} : vector<6x8x8xf32> to vector<1x8x8xf32>
    %99 = vector.shape_cast %98 : vector<1x8x8xf32> to vector<8x8xf32>
    %100 = vector.extract_strided_slice %51 {offsets = [5, 0, 0], sizes = [1, 8, 8], strides = [1, 1, 1]} : vector<6x8x8xf32> to vector<1x8x8xf32>
    %101 = vector.shape_cast %100 : vector<1x8x8xf32> to vector<8x8xf32>
    %102 = arith.mulf %92, %92 : vector<8x8xf32>
    %cst_38 = arith.constant 3.310000e-02 : f32
    %103 = vector.broadcast %cst_38 : f32 to vector<8x8xf32>
    %104 = arith.mulf %103, %102 : vector<8x8xf32>
    %105 = arith.mulf %104, %102 : vector<8x8xf32>
    %cst_39 = arith.constant 1.000000e+00 : f32
    %106 = vector.broadcast %cst_39 : f32 to vector<8x8xf32>
    %107 = arith.subf %106, %105 : vector<8x8xf32>
    %108 = arith.cmpf oge, %99, %107 : vector<8x8xf32>
    %109 = math.log %99 : vector<8x8xf32>
    %cst_40 = arith.constant 5.000000e-01 : f32
    %110 = vector.broadcast %cst_40 : f32 to vector<8x8xf32>
    %111 = arith.mulf %110, %102 : vector<8x8xf32>
    %cst_41 = arith.constant 1.000000e+00 : f32
    %112 = vector.broadcast %cst_41 : f32 to vector<8x8xf32>
    %113 = arith.subf %112, %97 : vector<8x8xf32>
    %114 = math.log %97 : vector<8x8xf32>
    %115 = arith.addf %113, %114 : vector<8x8xf32>
    %116 = arith.mulf %61, %115 : vector<8x8xf32>
    %117 = arith.addf %111, %116 : vector<8x8xf32>
    %118 = arith.cmpf oge, %109, %117 : vector<8x8xf32>
    %119 = arith.andi %108, %118 : vector<8x8xi1>
    %120 = arith.select %119, %101, %99 : vector<8x8xi1>, vector<8x8xf32>
    %121 = arith.mulf %61, %97 : vector<8x8xf32>
    %cst_42 = arith.constant 9.99999997E-7 : f32
    %122 = vector.broadcast %cst_42 : f32 to vector<8x8xf32>
    %123 = arith.addf %121, %122 : vector<8x8xf32>
    %124 = math.log %123 : vector<8x8xf32>
    %cst_43 = arith.constant 9.99999997E-7 : f32
    %125 = vector.broadcast %cst_43 : f32 to vector<8x8xf32>
    %126 = arith.addf %120, %125 : vector<8x8xf32>
    %127 = math.log %126 : vector<8x8xf32>
    %cst_44 = arith.constant 9.99999997E-7 : f32
    %128 = vector.broadcast %cst_44 : f32 to vector<8x8xf32>
    %129 = arith.addf %49, %128 : vector<8x8xf32>
    %130 = arith.divf %127, %129 : vector<8x8xf32>
    %131 = arith.addf %124, %130 : vector<8x8xf32>
    %132 = math.exp %131 : vector<8x8xf32>
    %cst_45 = arith.constant 9.99999997E-7 : f32
    %133 = vector.broadcast %cst_45 : f32 to vector<8x8xf32>
    %134 = arith.addf %50, %133 : vector<8x8xf32>
    %135 = arith.divf %132, %134 : vector<8x8xf32>
    %136 = arith.mulf %61, %97 : vector<8x8xf32>
    %cst_46 = arith.constant 9.99999997E-7 : f32
    %137 = vector.broadcast %cst_46 : f32 to vector<8x8xf32>
    %138 = arith.addf %50, %137 : vector<8x8xf32>
    %139 = arith.divf %136, %138 : vector<8x8xf32>
    %140 = arith.select %56, %135, %139 : vector<8x8xf32>
    %c4 = arith.constant 4 : index
    %c0_47 = arith.constant 0 : index
    %c0_48 = arith.constant 0 : index
    %141 = vector.load %arg2[%c4, %c0_47, %c0_48] : memref<8x32x32xf32, #tpu.memory_space<vmem>>, vector<1x32x32xf32>
    %142 = vector.shape_cast %141 : vector<1x32x32xf32> to vector<32x32xf32>
    %143 = vector.extract_strided_slice %142 {offsets = [0, 0], sizes = [8, 32], strides = [1, 1]} : vector<32x32xf32> to vector<8x32xf32>
    %cst_49 = arith.constant dense<0.000000e+00> : vector<8x32xf32>
    %144 = tpu.matmul %140, %143, %cst_49 {dimension_numbers = #tpu.dot_dimension_numbers<[1], [0], [0], [1], [0, 0, 1, 1], [], []>} : vector<8x8xf32>, vector<8x32xf32>, vector<8x32xf32> -> vector<8x32xf32>
    %145 = vector.extract_strided_slice %0 {offsets = [4, 0], sizes = [1, 32], strides = [1, 1]} : vector<8x32xf32> to vector<1x32xf32>
    %146 = vector.broadcast %145 : vector<1x32xf32> to vector<8x32xf32>
    %147 = arith.addf %144, %146 : vector<8x32xf32>
    %cst_50 = arith.constant 0.000000e+00 : f32
    %148 = vector.broadcast %cst_50 : f32 to vector<8x32xf32>
    %149 = arith.maximumf %147, %148 : vector<8x32xf32>
    %c5 = arith.constant 5 : index
    %c0_51 = arith.constant 0 : index
    %c0_52 = arith.constant 0 : index
    %150 = vector.load %arg2[%c5, %c0_51, %c0_52] : memref<8x32x32xf32, #tpu.memory_space<vmem>>, vector<1x32x32xf32>
    %151 = vector.shape_cast %150 : vector<1x32x32xf32> to vector<32x32xf32>
    %cst_53 = arith.constant dense<0.000000e+00> : vector<8x32xf32>
    %152 = tpu.matmul %149, %151, %cst_53 {dimension_numbers = #tpu.dot_dimension_numbers<[1], [0], [0], [1], [0, 0, 1, 1], [], []>} : vector<8x32xf32>, vector<32x32xf32>, vector<8x32xf32> -> vector<8x32xf32>
    %153 = vector.extract_strided_slice %0 {offsets = [5, 0], sizes = [1, 32], strides = [1, 1]} : vector<8x32xf32> to vector<1x32xf32>
    %154 = vector.broadcast %153 : vector<1x32xf32> to vector<8x32xf32>
    %155 = arith.addf %152, %154 : vector<8x32xf32>
    %cst_54 = arith.constant 0.000000e+00 : f32
    %156 = vector.broadcast %cst_54 : f32 to vector<8x32xf32>
    %157 = arith.maximumf %155, %156 : vector<8x32xf32>
    %c6 = arith.constant 6 : index
    %c0_55 = arith.constant 0 : index
    %c0_56 = arith.constant 0 : index
    %158 = vector.load %arg2[%c6, %c0_55, %c0_56] : memref<8x32x32xf32, #tpu.memory_space<vmem>>, vector<1x32x32xf32>
    %159 = vector.shape_cast %158 : vector<1x32x32xf32> to vector<32x32xf32>
    %cst_57 = arith.constant dense<0.000000e+00> : vector<8x32xf32>
    %160 = tpu.matmul %157, %159, %cst_57 {dimension_numbers = #tpu.dot_dimension_numbers<[1], [0], [0], [1], [0, 0, 1, 1], [], []>} : vector<8x32xf32>, vector<32x32xf32>, vector<8x32xf32> -> vector<8x32xf32>
    %161 = vector.extract_strided_slice %0 {offsets = [6, 0], sizes = [1, 32], strides = [1, 1]} : vector<8x32xf32> to vector<1x32xf32>
    %162 = vector.broadcast %161 : vector<1x32xf32> to vector<8x32xf32>
    %163 = arith.addf %160, %162 : vector<8x32xf32>
    %cst_58 = arith.constant 0.000000e+00 : f32
    %164 = vector.broadcast %cst_58 : f32 to vector<8x32xf32>
    %165 = arith.maximumf %163, %164 : vector<8x32xf32>
    %c7 = arith.constant 7 : index
    %c0_59 = arith.constant 0 : index
    %c0_60 = arith.constant 0 : index
    %166 = vector.load %arg2[%c7, %c0_59, %c0_60] : memref<8x32x32xf32, #tpu.memory_space<vmem>>, vector<1x32x32xf32>
    %167 = vector.shape_cast %166 : vector<1x32x32xf32> to vector<32x32xf32>
    %cst_61 = arith.constant dense<0.000000e+00> : vector<8x32xf32>
    %168 = tpu.matmul %165, %167, %cst_61 {dimension_numbers = #tpu.dot_dimension_numbers<[1], [0], [0], [1], [0, 0, 1, 1], [], []>} : vector<8x32xf32>, vector<32x32xf32>, vector<8x32xf32> -> vector<8x32xf32>
    %169 = vector.extract_strided_slice %0 {offsets = [7, 0], sizes = [1, 32], strides = [1, 1]} : vector<8x32xf32> to vector<1x32xf32>
    %170 = vector.broadcast %169 : vector<1x32xf32> to vector<8x32xf32>
    %171 = arith.addf %168, %170 : vector<8x32xf32>
    %cst_62 = arith.constant 0.000000e+00 : f32
    %172 = vector.broadcast %cst_62 : f32 to vector<8x32xf32>
    %173 = arith.maximumf %171, %172 : vector<8x32xf32>
    %174 = vector.broadcast %cst_62 : f32 to vector<8x32xf32>
    %175 = arith.subf %171, %174 : vector<8x32xf32>
    %176 = arith.cmpf one, %175, %175 : vector<8x32xf32>
    %177 = vector.broadcast %cst_62 : f32 to vector<8x32xf32>
    %178 = arith.addf %171, %177 : vector<8x32xf32>
    %179 = math.absf %175 : vector<8x32xf32>
    %cst_63 = arith.constant 0.000000e+00 : f32
    %180 = vector.broadcast %cst_63 : f32 to vector<8x32xf32>
    %181 = arith.subf %180, %179 : vector<8x32xf32>
    %182 = math.exp %181 : vector<8x32xf32>
    %183 = math.log1p %182 : vector<8x32xf32>
    %184 = arith.addf %173, %183 : vector<8x32xf32>
    %185 = arith.select %176, %178, %184 : vector<8x32xi1>, vector<8x32xf32>
    %cst_64 = arith.constant 9.99999997E-7 : f32
    %186 = vector.broadcast %cst_64 : f32 to vector<8x32xf32>
    %187 = arith.addf %186, %185 : vector<8x32xf32>
    %c0_65 = arith.constant 0 : index
    %c0_66 = arith.constant 0 : index
    %188 = vector.load %arg4[%c0_65, %c0_66] : memref<8x32xf32, #tpu.memory_space<vmem>>, vector<8x32xf32>
    tpu.vector_store %arg4[%c0_65, %c0_66], %187 {strides = array<i32>} : memref<8x32xf32, #tpu.memory_space<vmem>>, vector<8x32xf32>,
    %c0_67 = arith.constant 0 : index
    %c0_68 = arith.constant 0 : index
    %c0_69 = arith.constant 0 : index
    %189 = vector.load %arg5[%c0_67, %c0_68, %c0_69] : memref<3x8x8xf32, #tpu.memory_space<vmem>>, vector<1x8x8xf32>
    %190 = vector.shape_cast %189 : vector<1x8x8xf32> to vector<8x8xf32>
    %191 = vector.shape_cast %49 : vector<8x8xf32> to vector<1x8x8xf32>
    tpu.vector_store %arg5[%c0_67, %c0_68, %c0_69], %191 {strides = array<i32>} : memref<3x8x8xf32, #tpu.memory_space<vmem>>, vector<1x8x8xf32>,
    %c1_70 = arith.constant 1 : index
    %c0_71 = arith.constant 0 : index
    %c0_72 = arith.constant 0 : index
    %192 = vector.load %arg5[%c1_70, %c0_71, %c0_72] : memref<3x8x8xf32, #tpu.memory_space<vmem>>, vector<1x8x8xf32>
    %193 = vector.shape_cast %192 : vector<1x8x8xf32> to vector<8x8xf32>
    %194 = vector.shape_cast %50 : vector<8x8xf32> to vector<1x8x8xf32>
    tpu.vector_store %arg5[%c1_70, %c0_71, %c0_72], %194 {strides = array<i32>} : memref<3x8x8xf32, #tpu.memory_space<vmem>>, vector<1x8x8xf32>,
    %c2_73 = arith.constant 2 : index
    %c0_74 = arith.constant 0 : index
    %c0_75 = arith.constant 0 : index
    %195 = vector.load %arg5[%c2_73, %c0_74, %c0_75] : memref<3x8x8xf32, #tpu.memory_space<vmem>>, vector<1x8x8xf32>
    %196 = vector.shape_cast %195 : vector<1x8x8xf32> to vector<8x8xf32>
    %197 = vector.shape_cast %140 : vector<8x8xf32> to vector<1x8x8xf32>
    tpu.vector_store %arg5[%c2_73, %c0_74, %c0_75], %197 {strides = array<i32>} : memref<3x8x8xf32, #tpu.memory_space<vmem>>, vector<1x8x8xf32>,
    return
  }
}

</mosaic_0001>

<bundles_post_ra>
// kernel: tpu_custom_call.1
= control target key start
LH: loop header
LB: loop body
LE: loop exit
PB: predicated region body
PF: predicated region fallthrough
CT: control target
= control target key end

     0   :  { %11 = vsyncpa [#allocation3], 0  ;;  %s841_s0 = inlined_call_operand.hbm [shape: f32[8,16], index: 0, kind: input, shape index: {}]   ;;  %s842_s1 = inlined_call_operand.hbm [shape: f32[6,8,8], index: 1, kind: input, shape index: {}]   ;;  %s843_s2 = inlined_call_operand.hbm [shape: f32[8,32,32], index: 2, kind: input, shape index: {}]   ;;  %s844_s3 = inlined_call_operand.hbm [shape: f32[8,32], index: 3, kind: input, shape index: {}]   ;;  %s845_s4 = inlined_call_operand.hbm [shape: f32[8,32], index: 4, kind: output, shape index: {0}]   ;;  %s846_s5 = inlined_call_operand.hbm [shape: f32[3,8,8], index: 5, kind: output, shape index: {1}]  }
   0x1   :  { %12 = vsyncpa [#allocation6], 0 }
   0x2   :  { %13 = vsyncpa [#allocation9], 0 }
   0x3   :  { %14 = vsyncpa [#allocation4], 0  ;;  %s31_s20 = sshll.u32 %s842_s1, 4  ;;  %s32_s20 = int_to_ptr.hbm [resolvable:$true] %s31_s20 }
   0x4   :  { %15 = vsyncpa [#allocation12], 0  ;;  %s732_s21 = smov [#allocation5]   ;;  %s21_s25 = sshll.u32 %s841_s0, 4  ;;  %s22_s25 = int_to_ptr.hbm [resolvable:$true] %s21_s25 }
   0x5   :  { %s33_s22 = sshll.u32 %s732_s21, 4  ;;  %s733_s26 = smov 128   ;;  %s34_s22 = int_to_ptr.vmem [resolvable:$true] %s33_s22 }
   0x6   :  { %s734_s27 = smov 8   ;;  %s735_s28 = smov [#allocation2]  }
   0x7   :  { %39 = dma.hbm_to_vmem [thread:$0]  %s32_s20, 768, %s34_s22, [#allocation6], %s733_s26, %s733_s26, %s734_s27  }
   0x8   :  { %s23_s29 = sshll.u32 %s735_s28, 4  ;;  %s44_s6 = sshll.u32 %s843_s2, 4  ;;  %s24_s29 = int_to_ptr.vmem [resolvable:$true] %s23_s29  ;;  %s45_s6 = int_to_ptr.hbm [resolvable:$true] %s44_s6 }
   0x9   :  { %26 = dma.hbm_to_vmem [thread:$0]  %s22_s25, 128, %s24_s29, [#allocation3]  }
   0xa   :  { %s58_s0 = sshll.u32 %s844_s3, 4  ;;  %s736_s9 = smov [#allocation7]   ;;  %s59_s0 = int_to_ptr.hbm [resolvable:$true] %s58_s0 }
   0xb   :  { %s46_s10 = sshll.u32 %s736_s9, 4  ;;  %s737_s11 = smov [#allocation8]   ;;  %s47_s10 = int_to_ptr.vmem [resolvable:$true] %s46_s10 }
   0xc   :  { %52 = dma.hbm_to_vmem [thread:$0]  %s45_s6, 4096, %s47_s10, [#allocation6], %s733_s26, %s733_s26, %s734_s27  }
   0xd   :  { %s60_s12 = sshll.u32 %s737_s11, 4  ;;  %s61_s12 = int_to_ptr.vmem [resolvable:$true] %s60_s12 }
   0xe   :  { %63 = dma.hbm_to_vmem [thread:$0]  %s59_s0, 128, %s61_s12, [#allocation9]  }
   0xf   :  { %722 = dma.done.wait [#allocation3], 128  }
  0x10   :  { %723 = vsyncadd [#allocation3], 4294967168 }
  0x11   :  { %724 = dma.done.wait [#allocation6], 4864  }
  0x12   :  { %725 = vsyncadd [#allocation6], 4294962432 }
  0x13   :  { %726 = dma.done.wait [#allocation9], 128  }
  0x14   :  { %727 = vsyncadd [#allocation9], 4294967168  ;;  %v83_v0 = vld [vmem:[#allocation7 + $0x8] sm:$0xff]  ;;  %v82_v1 = vld [vmem:[#allocation7] sm:$0xff]  ;;  %vm85_vm0 = vcmask 130048   ;;  %vm116_vm1 = vcmask 261120  }
  0x15   :  { %103 = vmatpush.msra.mxu0 %v83_v0  ;;  %v81_v2 = vld [vmem:[#allocation2] sm:$0xff]  ;;  %v114_v3 = vld [vmem:[#allocation7 + $0x38] sm:$0xff]  ;;  %v113_v4 = vld [vmem:[#allocation7 + $0x30] sm:$0xff]  ;;  %vm225_vm4 = vcmask 64512   ;;  %s738_s2 = smov 120   ;;  %s739_s14 = smov [#allocation11]  }
  0x16   :  { %132 = vmatpush.msra.mxu1 %v114_v3  ;;  %v112_v5 = vld [vmem:[#allocation7 + $0x28] sm:$0xff]  ;;  %v111_v6 = vld [vmem:[#allocation7 + $0x20] sm:$0xff]  ;;  %v145_v7 = vld [vmem:[#allocation7 + $0x58] sm:$0xff]  ;;  %s510_s15 = sshll.u32 %s739_s14, 4  ;;  %s512_s18 = sshll.u32 %s846_s5, 4  ;;  %s511_s15 = int_to_ptr.vmem [resolvable:$true] %s510_s15  ;;  %s513_s18 = int_to_ptr.hbm [resolvable:$true] %s512_s18 }
  0x17   :  { %104 = vmatpush.msra.mxu0 %v82_v1  ;;  %162 = vmatpush.msra.mxu2 %v145_v7  ;;  %v789_v8 = vld [vmem:[#allocation8] sm:$0xff]  ;;  %v144_v13 = vld [vmem:[#allocation7 + $0x50] sm:$0xff]  ;;  %v143_v14 = vld [vmem:[#allocation7 + $0x48] sm:$0xff]  ;;  %s740_s5 = smov [#allocation10]   ;;  %s502_s22 = sshll.u32 %s845_s4, 4  ;;  %s503_s22 = int_to_ptr.hbm [resolvable:$true] %s502_s22 }
  0x18   :  { %532 = vmatmul.msk.f32.vlgmr.msra.gmra.mxu0 %vm85_vm0, %v81_v2  ;;  %133 = vmatpush.msra.mxu1 %v113_v4  ;;  %v84_v9 = vperm.slane %v789_v8, 0  ;;  %v142_v15 = vld [vmem:[#allocation7 + $0x40] sm:$0xff]  ;;  %v175_v16 = vld [vmem:[#allocation7 + $0x78] sm:$0xff]  ;;  %v115_v17 = vperm.slane %v789_v8, 1  ;;  %v174_v21 = vld [vmem:[#allocation7 + $0x70] sm:$0xff]  ;;  %v146_v24 = vperm.slane %v789_v8, 2 }
  0x19   :  { %163 = vmatpush.msra.mxu2 %v144_v13  ;;  %192 = vmatpush.msra.mxu3 %v175_v16  ;;  %v173_v22 = vld [vmem:[#allocation7 + $0x68] sm:$0xff]  ;;  %v172_v23 = vld [vmem:[#allocation7 + $0x60] sm:$0xff]  ;;  %v176_v28 = vperm.slane %v789_v8, 3  ;;  %v219_v16 = vld [vmem:[#allocation5] sm:$0xff]  ;;  %s500_s19 = sshll.u32 %s740_s5, 4  ;;  %s501_s19 = int_to_ptr.vmem [resolvable:$true] %s500_s19 }
  0x1a   :  { %134 = vmatpush.msra.mxu1 %v112_v5  ;;  %v409_v59 = vld [vmem:[#allocation7 + $0xc8] sm:$0xff] }
  0x1b   :  { %164 = vmatpush.msra.mxu2 %v143_v14  ;;  %193 = vmatpush.msra.mxu3 %v174_v21 }
  0x1c   :  { %135 = vmatpush.msra.mxu1 %v111_v6 }
  0x1d   :  { %165 = vmatpush.msra.mxu2 %v142_v15  ;;  %194 = vmatpush.msra.mxu3 %v173_v22 }
  0x1f   :  { %195 = vmatpush.msra.mxu3 %v172_v23 }
  0x95   :  { %v106_v10 = vpop.f32.mrf.mxu0 }
  0x96   :  { %v107_v11 = vadd.f32 %v106_v10, %v84_v9 }
  0x98   :  { %v109_v12 = vmax.f32 %v107_v11, 0.0 }
  0x9a   :  { %533 = vmatmul.msk.f32.vlgmr.msra.gmra.mxu1 %vm116_vm1, %v109_v12 }
 0x117   :  { %v137_v18 = vpop.f32.mrf.mxu1 }
 0x118   :  { %v138_v19 = vadd.f32 %v137_v18, %v115_v17  ;;  %v220_v18 = vld [vmem:[#allocation5 + $0x8] sm:$0xff] }
 0x11a   :  { %v140_v20 = vmax.f32 %v138_v19, 0.0  ;;  %v221_v19 = vld [vmem:[#allocation5 + $0x10] sm:$0xff] }
 0x11c   :  { %534 = vmatmul.msk.f32.vlgmr.msra.gmra.mxu2 %vm116_vm1, %v140_v20 }
 0x19f   :  { %v167_v25 = vpop.f32.mrf.mxu2 }
 0x1a0   :  { %v168_v26 = vadd.f32 %v167_v25, %v146_v24 }
 0x1a2   :  { %v170_v27 = vmax.f32 %v168_v26, 0.0  ;;  %v222_v26 = vld [vmem:[#allocation5 + $0x18] sm:$0xff] }
 0x1a4   :  { %535 = vmatmul.msk.f32.vlgmr.msra.gmra.mxu3 %vm116_vm1, %v170_v27 }
 0x227   :  { %v197_v29 = vpop.f32.mrf.mxu3 }
 0x228   :  { %v198_v30 = vadd.f32 %v197_v29, %v176_v28 }
 0x22a   :  { %v203_v31 = vand.u32 2147483647, %v198_v30  ;;  %v200_v42 = vmax.f32 %v198_v30, 0.0  ;;  %vm201_vm3 = vcmp.ne.f32.partialorder %v198_v30, %v198_v30 }
 0x22c   :  { %v204_v32 = vsub.f32 0.0, %v203_v31 }
 0x22e   :  { %v205_v33 = vmul.f32 1.442695, %v204_v32 }
 0x230   :  { %552 = vpow2.f32 %v205_v33 }
 0x236   :  { %v553_v34 = vpop.eup %552 }
 0x237   :  { %v207_v35 = vadd.f32 1.0, %v553_v34  ;;  %v210_v36 = vmul.f32 -0.5, %v553_v34  ;;  %v213_v38 = vand.u32 2147483647, %v553_v34 }
 0x239   :  { %554 = vlog2.f32 %v207_v35  ;;  %v211_v37 = vadd.f32 1.0, %v210_v36  ;;  %vm214_vm2 = vcmp.lt.f32.partialorder %v213_v38, 0.0004427343 }
 0x23b   :  { %v212_v41 = vmul.f32 %v553_v34, %v211_v37  ;;  %v223_v37 = vld [vmem:[#allocation5 + $0x20] sm:$0xff] }
 0x23f   :  { %v555_v39 = vpop.eup %554 }
 0x240   :  { %v209_v40 = vmul.f32 0.6931472, %v555_v39 }
 0x242   :  { %v215_v43 = vsel %vm214_vm2, %v212_v41, %v209_v40 }
 0x243   :  { %v216_v44 = vadd.f32 %v215_v43, %v200_v42 }
 0x245   :  { %v217_v45 = vsel %vm201_vm3, %v198_v30, %v216_v44 }
 0x246   :  { %v218_v46 = vadd.f32 1e-06, %v217_v45 }
 0x248   :  { %488 = vrot.lane.b32.xlu1 %v218_v46, %s738_s2  ;;  %v226_v47 = vsel %vm225_vm4, %v218_v46, inf  ;;  %486 = vst.msk [vmem:[#allocation11] sm:$0xff] %vm225_vm4, %v218_v46  ;;  %v800_v48 = vadd.f32 1e-06, %v218_v46  ;;  %v237_v57 = vadd.f32 1.0, %v218_v46 }
 0x249   :  { %227 = vmin.xlane.f32.xlu0 %v226_v47 }
 0x25d   :  { %330 = vrot.lane.b32.xlu0 %v800_v48, %s738_s2 }
 0x2ba   :  { %v489_v49 = vpop.permute.xlu1 %488 }
 0x2bb   :  { %492 = vst.msk [vmem:[#allocation11 + $0x8] sm:$0xff] %vm225_vm4, %v489_v49 }
 0x2bc   :  { %v228_v50 = vpop.xlane.xlu0 %227 }
 0x2bd   :  { %v229_v51 = vrot.slane %v228_v50, 4 }
 0x2bf   :  { %v230_v52 = vmin.f32 %v228_v50, %v229_v51 }
 0x2c1   :  { %v231_v53 = vrot.slane %v230_v52, 2 }
 0x2c3   :  { %v232_v54 = vmin.f32 %v230_v52, %v231_v53 }
 0x2c5   :  { %v233_v55 = vrot.slane %v232_v54, 1 }
 0x2c7   :  { %v234_v56 = vmin.f32 %v232_v54, %v233_v55  ;;  %v351_v54 = vld [vmem:[#allocation7 + $0x80] sm:$0xff] }
 0x2c8   :  { %371 = vmatpush.msrb.mxu0 %v351_v54 }
 0x2c9   :  { %541 = vpush %v234_v56 }
 0x2cf   :  { %v331_v47 = vpop.permute.xlu0 %330 }
 0x2fa   :  { %s542_s3 = spop %541 }
 0x2fb   :  { %p236_p0 = scmp.lt.f32.partialorder %s542_s3, 1.0 }
 0x2fd   :  { %s238_s13 = scalar_select %p236_p0, 1, 0 }
 0x2ff   :  { %v239_v58 = vstv %s238_s13 }
 0x300   :  { %vm804_vm5 = vcmp.eq.s32.totalorder %v239_v58, 1  ;;  %v380_v58 = vld [vmem:[#allocation7 + $0xb0] sm:$0xff] }
 0x301   :  { %v241_v60 = vsel %vm804_vm5, %v237_v57, %v218_v46  ;;  %v381_v57 = vld [vmem:[#allocation7 + $0xb8] sm:$0xff] }
 0x302   :  { %v810_v61 = vadd.f32 -0.33333334, %v241_v60  ;;  %v224_v60 = vld [vmem:[#allocation5 + $0x28] sm:$0xff]  ;;  %398 = vmatpush.msrb.mxu1 %v381_v57 }
 0x304   :  { %v243_v62 = vmul.f32 9.0, %v810_v61  ;;  %399 = vmatpush.msrb.mxu1 %v380_v58 }
 0x306   :  { %556 = vrsqrt.f32 %v243_v62  ;;  %vm251_vm6 = vcmp.eq.f32.partialorder %v243_v62, inf  ;;  %v254_v6 = vand.u32 2147483648, %v243_v62  ;;  %vm253_vm7 = vcmp.eq.f32.partialorder %v243_v62, 0.0 }
 0x30c   :  { %v557_v63 = vpop.eup %556 }
 0x30d   :  { %v245_v0 = vmul.f32 %v557_v63, %v243_v62 }
 0x30f   :  { %v246_v1 = vmul.f32 %v557_v63, %v245_v0 }
 0x311   :  { %v247_v2 = vmul.f32 0.5, %v246_v1 }
 0x313   :  { %v248_v3 = vsub.f32 1.5, %v247_v2 }
 0x315   :  { %v249_v4 = vmul.f32 %v557_v63, %v248_v3 }
 0x317   :  { %v250_v5 = vmul.f32 %v249_v4, %v243_v62  ;;  %v322_v4 = vand.u32 2147483648, %v800_v48 }
 0x319   :  { %v252_v7 = vsel %vm251_vm6, %v243_v62, %v250_v5  ;;  %vm316_vm6 = vweird.f32 %v800_v48  ;;  %v320_v5 = vand.u32 2147483647, %v800_v48 }
 0x31a   :  { %v255_v9 = vsel %vm253_vm7, %v254_v6, %v252_v7 }
 0x31b   :  { %558 = vrcp.f32 %v255_v9  ;;  %v267_v13 = vand.u32 2147483648, %v255_v9  ;;  %v265_v15 = vand.u32 2147483647, %v255_v9  ;;  %vm261_vm9 = vweird.f32 %v255_v9 }
 0x31c   :  { %560 = vrcp.f32 %v800_v48 }
 0x31d   :  { %v268_v20 = vor.u32 1.1754944e-38, %v267_v13  ;;  %vm266_vm11 = vcmp.eq.f32.partialorder %v265_v15, 8.507059e+37 }
 0x321   :  { %v559_v10 = vpop.eup %558 }
 0x322   :  { %v257_v11 = vmul.f32 %v559_v10, %v255_v9  ;;  %vm262_vm8 = vweird.f32 %v559_v10  ;;  %v561_v39 = vpop.eup %560 }
 0x323   :  { %vm263_vm10 = vmor %vm261_vm9, %vm262_vm8  ;;  %v312_v46 = vmul.f32 %v561_v39, %v800_v48  ;;  %vm317_vm3 = vweird.f32 %v561_v39  ;;  %vm321_vm8 = vcmp.eq.f32.partialorder %v320_v5, 8.507059e+37  ;;  %v342_v48 = vand.u32 2147483647, %v331_v47 }
 0x324   :  { %v258_v12 = vsub.f32 1.0, %v257_v11  ;;  %vm318_vm7 = vmor %vm316_vm6, %vm317_vm3  ;;  %v323_v11 = vor.u32 1.1754944e-38, %v322_v4 }
 0x325   :  { %v313_v56 = vsub.f32 1.0, %v312_v46 }
 0x326   :  { %v259_v14 = vmul.f32 %v559_v10, %v258_v12 }
 0x327   :  { %v314_v0 = vmul.f32 %v561_v39, %v313_v56 }
 0x328   :  { %v260_v17 = vadd.f32 %v559_v10, %v259_v14 }
 0x32a   :  { %v264_v21 = vsel %vm263_vm10, %v559_v10, %v260_v17  ;;  %vm338_vm10 = vweird.f32 %v331_v47 }
 0x32b   :  { %v269_v22 = vsel %vm266_vm11, %v268_v20, %v264_v21  ;;  %v344_v20 = vand.u32 2147483648, %v331_v47 }
 0x32c   :  { %v271_v23 = vmul.f32 %v269_v22, %v221_v19  ;;  %v275_v24 = vmul.f32 %v269_v22, %v220_v18  ;;  %v279_v25 = vmul.f32 %v269_v22, %v219_v16 }
 0x32e   :  { %v272_v27 = vadd.f32 1.0, %v271_v23  ;;  %v276_v28 = vadd.f32 1.0, %v275_v24  ;;  %v280_v29 = vadd.f32 1.0, %v279_v25 }
 0x330   :  { %vm273_vm12 = vcmp.gt.f32.partialorder %v272_v27, 0.0  ;;  %vm277_vm13 = vcmp.gt.f32.partialorder %v276_v28, 0.0  ;;  %vm281_vm14 = vcmp.gt.f32.partialorder %v280_v29, 0.0  ;;  %v379_v28 = vld [vmem:[#allocation7 + $0xa8] sm:$0xff]  ;;  %v378_v29 = vld [vmem:[#allocation7 + $0xa0] sm:$0xff] }
 0x331   :  { %v274_v30 = vsel %vm273_vm12, %v221_v19, %v222_v26  ;;  %vm343_vm12 = vcmp.eq.f32.partialorder %v342_v48, 8.507059e+37  ;;  %400 = vmatpush.msrb.mxu1 %v379_v28 }
 0x332   :  { %v278_v31 = vsel %vm277_vm13, %v220_v18, %v274_v30  ;;  %v411_v30 = vld [vmem:[#allocation7 + $0xd8] sm:$0xff] }
 0x333   :  { %v282_v32 = vsel %vm281_vm14, %v219_v16, %v278_v31  ;;  %401 = vmatpush.msrb.mxu1 %v378_v29  ;;  %v410_v31 = vld [vmem:[#allocation7 + $0xd0] sm:$0xff]  ;;  %428 = vmatpush.msrb.mxu2 %v411_v30 }
 0x334   :  { %v283_v33 = vmul.f32 %v282_v32, %v269_v22  ;;  %v286_v36 = vmul.f32 %v282_v32, %v282_v32  ;;  %v345_v22 = vor.u32 1.1754944e-38, %v344_v20  ;;  %v352_v32 = vperm.slane %v789_v8, 4 }
 0x335   :  { %429 = vmatpush.msrb.mxu2 %v410_v31 }
 0x336   :  { %v284_v34 = vadd.f32 1.0, %v283_v33  ;;  %v287_v38 = vmul.f32 0.0331, %v286_v36  ;;  %v293_v51 = vmul.f32 0.5, %v286_v36 }
 0x337   :  { %430 = vmatpush.msrb.mxu2 %v409_v59 }
 0x338   :  { %v285_v35 = vmax.f32 %v284_v34, 1e-12  ;;  %v288_v42 = vmul.f32 %v287_v38, %v286_v36  ;;  %v408_v36 = vld [vmem:[#allocation7 + $0xc0] sm:$0xff]  ;;  %v440_v38 = vld [vmem:[#allocation7 + $0xf0] sm:$0xff] }
 0x339   :  { %431 = vmatpush.msrb.mxu2 %v408_v36 }
 0x33a   :  { %562 = vlog2.f32 %v285_v35  ;;  %v294_v43 = vsub.f32 1.0, %v285_v35  ;;  %v289_v50 = vsub.f32 1.0, %v288_v42  ;;  %v303_v53 = vmul.f32 %v810_v61, %v285_v35 }
 0x33b   :  { %564 = vlog2.f32 %v223_v37 }
 0x33c   :  { %566 = vrcp.f32 %v331_v47  ;;  %vm290_vm15 = vcmp.ge.f32.partialorder %v223_v37, %v289_v50  ;;  %v304_v62 = vadd.f32 1e-06, %v303_v53  ;;  %v442_v50 = vperm.slane %v789_v8, 7 }
 0x33e   :  { %568 = vlog2.f32 %v304_v62 }
 0x340   :  { %v563_v40 = vpop.eup %562 }
 0x341   :  { %v565_v41 = vpop.eup %564  ;;  %v296_v44 = vmul.f32 0.6931472, %v563_v40 }
 0x342   :  { %v292_v49 = vmul.f32 0.6931472, %v565_v41  ;;  %v567_v2 = vpop.eup %566 }
 0x343   :  { %v297_v45 = vadd.f32 %v296_v44, %v294_v43  ;;  %v334_v3 = vmul.f32 %v567_v2, %v331_v47  ;;  %vm339_vm9 = vweird.f32 %v567_v2  ;;  %v439_v43 = vld [vmem:[#allocation7 + $0xe8] sm:$0xff]  ;;  %v438_v44 = vld [vmem:[#allocation7 + $0xe0] sm:$0xff] }
 0x344   :  { %v569_v6 = vpop.eup %568  ;;  %vm340_vm11 = vmor %vm338_vm10, %vm339_vm9 }
 0x345   :  { %v298_v52 = vmul.f32 %v810_v61, %v297_v45  ;;  %v315_v61 = vadd.f32 %v561_v39, %v314_v0  ;;  %v335_v10 = vsub.f32 1.0, %v334_v3  ;;  %v306_v14 = vmul.f32 0.6931472, %v569_v6 }
 0x346   :  { %v412_v45 = vperm.slane %v789_v8, 6 }
 0x347   :  { %v299_v55 = vadd.f32 %v298_v52, %v293_v51  ;;  %v319_v7 = vsel %vm318_vm7, %v561_v39, %v315_v61  ;;  %v336_v16 = vmul.f32 %v567_v2, %v335_v10  ;;  %v382_v39 = vperm.slane %v789_v8, 5 }
 0x348   :  { %v324_v13 = vsel %vm321_vm8, %v323_v11, %v319_v7 }
 0x349   :  { %vm300_vm0 = vcmp.ge.f32.partialorder %v292_v49, %v299_v55  ;;  %v337_v19 = vadd.f32 %v567_v2, %v336_v16 }
 0x34a   :  { %vm301_vm2 = vmand %vm290_vm15, %vm300_vm0 }
 0x34b   :  { %v302_v63 = vsel %vm301_vm2, %v224_v60, %v223_v37  ;;  %v341_v21 = vsel %vm340_vm11, %v567_v2, %v337_v19  ;;  %v441_v37 = vld [vmem:[#allocation7 + $0xf8] sm:$0xff] }
 0x34c   :  { %v307_v1 = vadd.f32 1e-06, %v302_v63  ;;  %v346_v24 = vsel %vm343_vm12, %v345_v22, %v341_v21  ;;  %458 = vmatpush.msrb.mxu3 %v441_v37 }
 0x34d   :  { %v348_v26 = vmul.f32 %v346_v24, %v303_v53 }
 0x34e   :  { %570 = vlog2.f32 %v307_v1  ;;  %459 = vmatpush.msrb.mxu3 %v440_v38 }
 0x350   :  { %460 = vmatpush.msrb.mxu3 %v439_v43 }
 0x352   :  { %461 = vmatpush.msrb.mxu3 %v438_v44 }
 0x354   :  { %v571_v9 = vpop.eup %570 }
 0x355   :  { %v309_v12 = vmul.f32 0.6931472, %v571_v9 }
 0x357   :  { %v325_v15 = vmul.f32 %v324_v13, %v309_v12 }
 0x359   :  { %v326_v17 = vadd.f32 %v325_v15, %v306_v14 }
 0x35b   :  { %v327_v18 = vmul.f32 1.442695, %v326_v17 }
 0x35d   :  { %572 = vpow2.f32 %v327_v18 }
 0x363   :  { %v573_v23 = vpop.eup %572 }
 0x364   :  { %v347_v25 = vmul.f32 %v573_v23, %v346_v24 }
 0x366   :  { %v349_v27 = vsel %vm804_vm5, %v347_v25, %v348_v26 }
 0x367   :  { %494 = vst.msk [vmem:[#allocation11 + $0x10] sm:$0xff] %vm225_vm4, %v349_v27  ;;  %537 = vmatmul.msk.f32.vlgmr.msrb.gmra.mxu0 %vm225_vm4, %v349_v27 }
 0x368   :  { %518 = dma.vmem_to_hbm [thread:$0]  %s511_s15, 384, %s513_s18, [#allocation12], %s733_s26, %s733_s26, %s734_s27  }
 0x3e4   :  { %v373_v33 = vpop.f32.mrf.mxu0 }
 0x3e5   :  { %v374_v34 = vadd.f32 %v373_v33, %v352_v32 }
 0x3e7   :  { %v376_v35 = vmax.f32 %v374_v34, 0.0 }
 0x3e9   :  { %538 = vmatmul.msk.f32.vlgmr.msrb.gmra.mxu1 %vm116_vm1, %v376_v35 }
 0x466   :  { %v403_v40 = vpop.f32.mrf.mxu1 }
 0x467   :  { %v404_v41 = vadd.f32 %v403_v40, %v382_v39 }
 0x469   :  { %v406_v42 = vmax.f32 %v404_v41, 0.0 }
 0x46b   :  { %539 = vmatmul.msk.f32.vlgmr.msrb.gmra.mxu2 %vm116_vm1, %v406_v42 }
 0x4ee   :  { %v433_v46 = vpop.f32.mrf.mxu2 }
 0x4ef   :  { %v434_v47 = vadd.f32 %v433_v46, %v412_v45 }
 0x4f1   :  { %v436_v49 = vmax.f32 %v434_v47, 0.0 }
 0x4f3   :  { %540 = vmatmul.msk.f32.vlgmr.msrb.gmra.mxu3 %vm116_vm1, %v436_v49 }
 0x576   :  { %v463_v51 = vpop.f32.mrf.mxu3 }
 0x577   :  { %v464_v52 = vadd.f32 %v463_v51, %v442_v50 }
 0x579   :  { %v469_v53 = vand.u32 2147483647, %v464_v52  ;;  %v466_v2 = vmax.f32 %v464_v52, 0.0  ;;  %vm467_vm5 = vcmp.ne.f32.partialorder %v464_v52, %v464_v52 }
 0x57b   :  { %v470_v54 = vsub.f32 0.0, %v469_v53 }
 0x57d   :  { %v471_v55 = vmul.f32 1.442695, %v470_v54 }
 0x57f   :  { %574 = vpow2.f32 %v471_v55 }
 0x585   :  { %v575_v56 = vpop.eup %574 }
 0x586   :  { %v473_v57 = vadd.f32 1.0, %v575_v56  ;;  %v476_v58 = vmul.f32 -0.5, %v575_v56  ;;  %v479_v62 = vand.u32 2147483647, %v575_v56 }
 0x588   :  { %576 = vlog2.f32 %v473_v57  ;;  %v477_v60 = vadd.f32 1.0, %v476_v58  ;;  %vm480_vm4 = vcmp.lt.f32.partialorder %v479_v62, 0.0004427343 }
 0x58a   :  { %v478_v1 = vmul.f32 %v575_v56, %v477_v60 }
 0x58e   :  { %v577_v63 = vpop.eup %576 }
 0x58f   :  { %v475_v0 = vmul.f32 0.6931472, %v577_v63 }
 0x591   :  { %v481_v61 = vsel %vm480_vm4, %v478_v1, %v475_v0 }
 0x592   :  { %v482_v3 = vadd.f32 %v481_v61, %v466_v2 }
 0x594   :  { %v483_v8 = vsel %vm467_vm5, %v464_v52, %v482_v3 }
 0x595   :  { %v484_v4 = vadd.f32 1e-06, %v483_v8 }
 0x597   :  { %485 = vst.msk [vmem:[#allocation10] sm:$0xff] %vm116_vm1, %v484_v4 }
 0x598   :  { %505 = dma.vmem_to_hbm [thread:$0]  %s501_s19, 128, %s503_s22, [#allocation4]  }
 0x599   :  { %728 = dma.done.wait [#allocation4], 128  }
 0x59a   :  { %729 = vsyncadd [#allocation4], 4294967168 }
 0x59b   :  { %730 = dma.done.wait [#allocation12], 384  }
 0x59c   :  { %731 = vsyncadd [#allocation12], 4294966912 }
 0x59d   :  { %527 = vsyncpa [#allocation3], 1 }
 0x59e   :  { %528 = vsyncpa [#allocation6], 1 }
 0x59f   :  { %529 = vsyncpa [#allocation9], 1 }
 0x5a0   :  { %530 = vsyncpa [#allocation4], 1 }
 0x5a1   :  { %531 = vsyncpa [#allocation12], 1 }

</bundles_post_ra>
